<compile_context>
chip_gen: v6e
topology: v6e:2x2x1
jax: 0.10.0
libtpu: 0.0.40
codegen_flags: <defaults>
</compile_context>

<pallas_src>
import jax
import jax.numpy as jnp
from jax import lax
from jax.experimental import pallas as pl
from jax.experimental.pallas import tpu as pltpu

# ---- problem sizes (small, consistent with the module defaults) -------------
N, H, W = 2, 8, 8
NHW = N * H * W                    # 128 -> flattened batch*spatial fills the lanes
PLANES = 8
EXPANSION = 4
INPLANES = PLANES * EXPANSION      # 32; == COUT so the raw residual add is valid
COUT = PLANES * EXPANSION          # 32
EPS = 1e-5

assert INPLANES == COUT, "residual add requires inplanes == planes * expansion"


# ---- roll-direction probe ----------------------------------------------------
def _probe_roll_unit():
    """Return u in {+1, -1} such that
         pltpu.roll(v, (u * s) % L, axis=-1)[:, l] == v[:, (l + s) % L].
    Probed once on device so the 3x3 window gather is robust to the lane-rotate
    direction convention across jax versions."""
    def k(x_ref, o_ref):
        o_ref[...] = pltpu.roll(x_ref[...], shift=1, axis=1)

    lane = lax.broadcasted_iota(jnp.float32, (8, NHW), 1)
    r = jax.device_get(
        pl.pallas_call(k, out_shape=jax.ShapeDtypeStruct((8, NHW), jnp.float32))(lane))
    v0 = int(r[0, 0])
    if v0 == NHW - 1:      # jnp.roll convention: roll(x, 1)[0] == x[-1]
        return -1
    if v0 == 1:            # opposite convention: roll(x, 1)[l] == x[l + 1]
        return 1
    raise AssertionError(f"unexpected pltpu.roll convention: probe lane0 = {v0}")


# ---- fused kernel ------------------------------------------------------------
def make_bottleneck_kernel(roll_unit):
    def kernel(x_ref, w1_ref, w2_ref, w3_ref, b_ref, o_ref):
        # x_ref : (INPLANES, NHW)      f32   channels-major activations (lane-dense)
        # w1_ref: (PLANES, INPLANES)   bf16  conv1 weight, bn1 scale folded in
        # w2_ref: (PLANES, 9*PLANES)   bf16  conv2 weight, tap-major im2col layout
        # w3_ref: (COUT, PLANES)       bf16  conv3 weight, bn3 scale folded in
        # b_ref : (2*PLANES+COUT, 1)   f32   [bn1 bias; bn2 bias; bn3 bias]
        # o_ref : (COUT, NHW)          f32   lane-dense output slab
        x = x_ref[...]                                            # kept f32 for residual

        # conv1 (1x1) + bn1 + relu : one channel matmul on the MXU
        h1 = jnp.dot(w1_ref[...], x.astype(jnp.bfloat16),
                     preferred_element_type=jnp.float32)          # (P, NHW)
        h1 = jnp.maximum(h1 + b_ref[0:PLANES, :], 0.0)

        # conv2 (3x3, stride 1, pad 1) + bn2 + relu:
        # nine shifted windows via single-vreg lane rolls + boundary masks,
        # contracted in ONE im2col matmul (K = 9 * PLANES = 72).
        lane = lax.broadcasted_iota(jnp.int32, (PLANES, NHW), 1)
        yy = (lane // W) % H                                      # y coord of each lane
        xx = lane % W                                             # x coord of each lane
        cols = []
        for ky in range(3):
            dy = ky - 1
            for kx in range(3):
                dx = kx - 1
                s = dy * W + dx                                   # flattened lane shift
                if s == 0:
                    cols.append(h1)
                    continue
                win = pltpu.roll(h1, shift=(roll_unit * s) % NHW, axis=1)
                valid = ((yy + dy >= 0) & (yy + dy < H) &
                         (xx + dx >= 0) & (xx + dx < W))
                cols.append(jnp.where(valid, win, 0.0))
        col = jnp.concatenate(cols, axis=0).astype(jnp.bfloat16)  # (9*P, NHW)
        h2 = jnp.dot(w2_ref[...], col, preferred_element_type=jnp.float32)
        h2 = jnp.maximum(h2 + b_ref[PLANES:2 * PLANES, :], 0.0)   # (P, NHW)

        # conv3 (1x1) + bn3, residual add, relu
        h3 = jnp.dot(w3_ref[...], h2.astype(jnp.bfloat16),
                     preferred_element_type=jnp.float32)          # (COUT, NHW)
        h3 = h3 + b_ref[2 * PLANES:2 * PLANES + COUT, :]
        o_ref[...] = jnp.maximum(h3 + x, 0.0)

    return kernel


def build_bottleneck_fn():
    kernel = make_bottleneck_kernel(_probe_roll_unit())
    vmem = pl.BlockSpec(memory_space=pltpu.MemorySpace.VMEM)      # whole array in VMEM

    @jax.jit
    def bottleneck(x_nchw, w1_eff, w2_eff, w3_eff, bias):
        # NCHW -> channels-major (C, N*H*W): whole batch, single kernel invocation.
        x_cs = jnp.transpose(x_nchw, (1, 0, 2, 3)).reshape(INPLANES, NHW)
        out_cs = pl.pallas_call(
            kernel,
            out_shape=jax.ShapeDtypeStruct((COUT, NHW), jnp.float32),
            in_specs=[vmem] * 5,
            out_specs=vmem,
        )(x_cs, w1_eff, w2_eff, w3_eff, bias)
        return jnp.transpose(out_cs.reshape(COUT, N, H, W), (1, 0, 2, 3))

    return bottleneck


# ---- parameter preparation (BN folding, bf16 weights, bias packing) ----------
def fold_bn(gamma, beta, mean, var):
    scale = gamma / jnp.sqrt(var + EPS)
    return scale, beta - mean * scale


def prepare_params(w1, w2, w3, bn1, bn2, bn3):
    """Fold BN scales into the conv weights (bf16 MXU operands) and pack the
    three remaining BN biases into one (48, 1) column array (single DMA)."""
    s1, b1 = fold_bn(*bn1)
    s2, b2 = fold_bn(*bn2)
    s3, b3 = fold_bn(*bn3)
    w1_eff = (w1.reshape(PLANES, INPLANES) * s1[:, None]).astype(jnp.bfloat16)
    # (Pout, Pin, 3, 3) -> (Pout, ky, kx, Pin) -> (Pout, 9*Pin): column order
    # matches the tap-major / channel-minor im2col rows built in the kernel.
    w2_eff = (jnp.transpose(w2, (0, 2, 3, 1)).reshape(PLANES, 9 * PLANES)
              * s2[:, None]).astype(jnp.bfloat16)
    w3_eff = (w3.reshape(COUT, PLANES) * s3[:, None]).astype(jnp.bfloat16)
    bias = jnp.concatenate([b1, b2, b3]).astype(jnp.float32).reshape(-1, 1)
    return w1_eff, w2_eff, w3_eff, bias


# ---- pure-JAX reference (faithful NCHW convs, same precision choices) --------
def bottleneck_ref(x, w1, w2, w3, bn1, bn2, bn3):
    dn = ("NCHW", "OIHW", "NCHW")

    def fold_w(w, bn):
        s, b = fold_bn(*bn)
        we = (w * s[:, None, None, None]).astype(jnp.bfloat16).astype(jnp.float32)
        return we, b

    w1e, b1 = fold_w(w1, bn1)
    w2e, b2 = fold_w(w2, bn2)
    w3e, b3 = fold_w(w3, bn3)
    r = lambda t: t.astype(jnp.bfloat16).astype(jnp.float32)   # bf16 operand rounding

    h = lax.conv_general_dilated(r(x), w1e, (1, 1), "VALID", dimension_numbers=dn)
    h = jnp.maximum(h + b1[None, :, None, None], 0.0)
    h = lax.conv_general_dilated(r(h), w2e, (1, 1), ((1, 1), (1, 1)),
                                 dimension_numbers=dn)
    h = jnp.maximum(h + b2[None, :, None, None], 0.0)
    h = lax.conv_general_dilated(r(h), w3e, (1, 1), "VALID", dimension_numbers=dn)
    h = h + b3[None, :, None, None]
    return jnp.maximum(h + x, 0.0)


if __name__ == "__main__":
    key = jax.random.PRNGKey(0)
    ks = jax.random.split(key, 7)

    # input / weights in the PyTorch (NCHW / OIHW) convention
    x = jax.random.normal(ks[0], (N, INPLANES, H, W), jnp.float32)
    w1 = jax.random.normal(ks[1], (PLANES, INPLANES, 1, 1), jnp.float32) * 0.1
    w2 = jax.random.normal(ks[2], (PLANES, PLANES, 3, 3), jnp.float32) * 0.1
    w3 = jax.random.normal(ks[3], (COUT, PLANES, 1, 1), jnp.float32) * 0.1

    def bn_params(k, c):
        k1, k2, k3, k4 = jax.random.split(k, 4)
        gamma = 0.5 + jax.random.uniform(k1, (c,), jnp.float32)
        beta = 0.1 * jax.random.normal(k2, (c,), jnp.float32)
        mean = 0.1 * jax.random.normal(k3, (c,), jnp.float32)
        var = 0.5 + jax.random.uniform(k4, (c,), jnp.float32)
        return gamma, beta, mean, var

    bn1 = bn_params(ks[4], PLANES)
    bn2 = bn_params(ks[5], PLANES)
    bn3 = bn_params(ks[6], COUT)

    bottleneck = build_bottleneck_fn()
    params = prepare_params(w1, w2, w3, bn1, bn2, bn3)

    out = jax.block_until_ready(bottleneck(x, *params))

    ref = bottleneck_ref(x, w1, w2, w3, bn1, bn2, bn3)
    assert out.shape == (N, COUT, H, W)
    max_err = float(jnp.max(jnp.abs(out - ref)))
    assert jnp.allclose(out, ref, atol=5e-3, rtol=5e-3), f"mismatch vs reference: {max_err}"

    print("KERNEL_OK")
</pallas_src>

<mosaic_0001>
module attributes {stable_mosaic.version = 11 : i64} {
  func.func @k(%arg0: memref<8x128xf32, #tpu.memory_space<vmem>>, %arg1: memref<8x128xf32, #tpu.memory_space<vmem>>) attributes {dimension_semantics = [], scalar_prefetch = 0 : i64, scratch_operands = 0 : i64, tpu.core_type = #tpu.core_type<tc>} {
    %c0 = arith.constant 0 : index
    %c0_0 = arith.constant 0 : index
    %0 = vector.load %arg0[%c0, %c0_0] : memref<8x128xf32, #tpu.memory_space<vmem>>, vector<8x128xf32>
    %c1_i32 = arith.constant 1 : i32
    %1 = tpu.dynamic_rotate %0 by %c1_i32 dim 1 : vector<8x128xf32>, i32 -> vector<8x128xf32>
    %c0_1 = arith.constant 0 : index
    %c0_2 = arith.constant 0 : index
    %2 = vector.load %arg1[%c0_1, %c0_2] : memref<8x128xf32, #tpu.memory_space<vmem>>, vector<8x128xf32>
    tpu.vector_store %arg1[%c0_1, %c0_2], %1 {strides = array<i32>} : memref<8x128xf32, #tpu.memory_space<vmem>>, vector<8x128xf32>,
    return
  }
}

</mosaic_0001>

<bundles_post_ra>
// kernel: tpu_custom_call.1
= control target key start
LH: loop header
LB: loop body
LE: loop exit
PB: predicated region body
PF: predicated region fallthrough
CT: control target
= control target key end

     0   :  { %6 = vsyncpa [#allocation3], 0  ;;  %s106_s0 = inlined_call_operand.hbm [shape: f32[8,128], index: 0, kind: input, shape index: {}]   ;;  %s107_s1 = inlined_call_operand.hbm [shape: f32[8,128], index: 1, kind: output, shape index: {}]  }
   0x1   :  { %7 = vsyncpa [#allocation4], 0  ;;  %s87_s6 = smov [#allocation2]  }
   0x2   :  { %s14_s7 = sshll.u32 %s87_s6, 4  ;;  %s15_s7 = int_to_ptr.vmem [resolvable:$true] %s14_s7 }
   0x3   :  { %s51_s8 = scalar_lea.vmem %s15_s7, 128  ;;  %p56_p1 = scmp.lt.s32.totalorder %s15_s7, %s15_s7 }
   0x4   :  { %p52_p0 = scmp.ne.s32.totalorder %s15_s7, %s51_s8  ;;  %p57_p2 = scmp.lt.s32.totalorder %s51_s8, %s51_s8 }
   0x6   :  { %p58_p3 = por %p57_p2, %p56_p1 }
   0x8   :  { %p59_p4 = pnand %p58_p3, %p52_p0 }
   0xa   :  { %62 = shalt.err (!%p59_p4)
}
   0xb   :  { %17 = dma.hbm_to_vmem [thread:$0]  %s106_s0, 128, %s15_s7, [#allocation3]  }
   0xc   :  { %83 = dma.done.wait [#allocation3], 128  }
   0xd   :  { %84 = vsyncadd [#allocation3], 4294967168  ;;  %v21_v0 = vld [vmem:[#allocation2] sm:$0xff]  ;;  %s88_s11 = smov 1   ;;  %s89_s12 = smov [#allocation5]  }
   0xe   :  { %22 = vrot.lane.b32.xlu0 %v21_v0, %s88_s11  ;;  %s31_s13 = sshll.u32 %s89_s12, 4  ;;  %s32_s13 = int_to_ptr.vmem [resolvable:$true] %s31_s13 }
   0xf   :  { %s63_s14 = scalar_lea.vmem %s32_s13, 128  ;;  %p68_p6 = scmp.lt.s32.totalorder %s32_s13, %s32_s13 }
  0x10   :  { %p64_p5 = scmp.ne.s32.totalorder %s32_s13, %s63_s14  ;;  %p69_p7 = scmp.lt.s32.totalorder %s63_s14, %s63_s14 }
  0x12   :  { %p70_p8 = por %p69_p7, %p68_p6 }
  0x14   :  { %p71_p9 = pnand %p70_p8, %p64_p5 }
  0x80   :  { %v23_v1 = vpop.permute.xlu0 %22 }
  0x81   :  { %24 = vst [vmem:[#allocation5] sm:$0xff] %v23_v1 }
  0x82   :  { %74 = shalt.err (!%p71_p9)
}
  0x83   :  { %34 = dma.vmem_to_hbm [thread:$0]  %s32_s13, 128, %s107_s1, [#allocation4]  }
  0x84   :  { %85 = dma.done.wait [#allocation4], 128  }
  0x85   :  { %86 = vsyncadd [#allocation4], 4294967168 }
  0x86   :  { %38 = vsyncpa [#allocation3], 1 }
  0x87   :  { %39 = vsyncpa [#allocation4], 1 }

</bundles_post_ra>
